<compile_context>
chip_gen: v7x
topology: tpu7x:2x2x1
jax: 0.10.0
libtpu: 0.0.40
codegen_flags: <defaults>
</compile_context>

<pallas_src>
import functools

import jax
import jax.numpy as jnp
from jax import lax
from jax.experimental import pallas as pl
from jax.experimental.pallas import tpu as pltpu


def _cam_kernel(gamma_ref, x_full_ref, x_rows_ref, out_ref, *, matmul_dtype):
    # x_full_ref: (1, C, HWp)  -- resident across the C-tile grid axis
    # x_rows_ref: (1, Ct, HWp) -- query rows for this tile
    x_f32 = x_full_ref[0]
    q_f32 = x_rows_ref[0]

    x_mm = x_f32.astype(matmul_dtype)
    q_mm = q_f32.astype(matmul_dtype)

    # energy[i, j] = <q_i, x_j>  -- NT matmul, no explicit transpose.
    energy = lax.dot_general(
        q_mm, x_mm,
        dimension_numbers=(((1,), (1,)), ((), ())),
        preferred_element_type=jnp.float32)

    # softmax(rowmax(E) - E) == exp(rowmin(E) - E) / sum(...): single reduction.
    e_min = jnp.min(energy, axis=-1, keepdims=True)
    ex = jnp.exp(e_min - energy)
    denom = jnp.sum(ex, axis=-1, keepdims=True)
    attn = ex * pl.reciprocal(denom, approx=True)

    out = jnp.dot(attn.astype(matmul_dtype), x_mm,
                  preferred_element_type=jnp.float32)

    out_ref[0] = (gamma_ref[0] * out + q_f32).astype(out_ref.dtype)


def _choose_ct(c):
    """Channel row-tile: multiple of the MXU width when C is large enough."""
    for ct in (256, 128):
        if c > ct and c % ct == 0:
            return ct
    return c  # no tiling; block == full dim is always a legal block shape


def cam_module_forward(x, gamma, *, matmul_dtype=jnp.bfloat16):
    """x: (B, C, H, W) float32, gamma: (1,) float32. Returns (B, C, H, W)."""
    B, C, H, W = x.shape
    HW = H * W
    HWp = ((HW + 127) // 128) * 128          # lane-dense spatial axis
    x_flat = x.reshape(B, C, HW)
    if HWp != HW:
        # Zero padding does not change energy (x @ x^T) nor the attention output.
        x_flat = jnp.pad(x_flat, ((0, 0), (0, 0), (0, HWp - HW)))

    ct = _choose_ct(C)

    # Explicit VMEM budget: resident slab + double-buffered row/output tiles
    # + in-kernel temporaries, with headroom; capped at 64 MiB (v7x physical).
    f32b = 4
    mmb = jnp.dtype(matmul_dtype).itemsize
    est = (2 * C * HWp * f32b            # resident x slab (double-buffered)
           + 2 * ct * HWp * f32b         # query-row tiles
           + 2 * ct * HWp * f32b         # output tiles
           + (C + ct) * HWp * mmb        # bf16 matmul copies
           + ct * HWp * f32b             # f32 out temporary
           + 4 * ct * C * f32b)          # (Ct, C) softmax temporaries
    vmem_limit = int(min(max(2 * est, 16 * 1024 * 1024), 64 * 1024 * 1024))

    kernel = functools.partial(_cam_kernel, matmul_dtype=matmul_dtype)

    out_flat = pl.pallas_call(
        kernel,
        out_shape=jax.ShapeDtypeStruct((B, C, HWp), x.dtype),
        grid_spec=pltpu.PrefetchScalarGridSpec(
            num_scalar_prefetch=0,
            grid=(B, C // ct),
            in_specs=[
                pl.BlockSpec(memory_space=pltpu.SMEM),                 # gamma
                pl.BlockSpec((1, C, HWp), lambda b, ci: (b, 0, 0)),    # resident slab
                pl.BlockSpec((1, ct, HWp), lambda b, ci: (b, ci, 0)),  # query rows
            ],
            out_specs=pl.BlockSpec((1, ct, HWp), lambda b, ci: (b, ci, 0)),
        ),
        compiler_params=pltpu.CompilerParams(
            dimension_semantics=("parallel", "parallel"),
            vmem_limit_bytes=vmem_limit,
        ),
    )(gamma, x_flat, x_flat)

    if HWp != HW:
        out_flat = out_flat[:, :, :HW]
    return out_flat.reshape(B, C, H, W)


def _cam_reference(x, gamma, matmul_dtype=jnp.float32):
    """Pure-JAX reference matching the PyTorch module (optional bf16 matmuls)."""
    B, C, H, W = x.shape
    xf = x.reshape(B, C, H * W)
    xm = xf.astype(matmul_dtype)
    energy = jnp.einsum("bcd,bed->bce", xm, xm,
                        preferred_element_type=jnp.float32)
    energy_new = jnp.max(energy, axis=-1, keepdims=True) - energy
    attn = jax.nn.softmax(energy_new, axis=-1)
    out = jnp.einsum("bce,bed->bcd", attn.astype(matmul_dtype), xm,
                     preferred_element_type=jnp.float32).reshape(B, C, H, W)
    return gamma[0] * out + x


if __name__ == "__main__":
    key = jax.random.PRNGKey(0)
    B, C, H, W = 2, 4, 16, 16
    x = jax.random.normal(key, (B, C, H, W), dtype=jnp.float32)

    gamma_zero = jnp.zeros((1,), dtype=jnp.float32)   # module's init value
    gamma_nz = jnp.array([0.5], dtype=jnp.float32)    # exercises attention path

    # f32-matmul path: algorithm must match the module reference closely.
    out_f32 = jax.block_until_ready(
        cam_module_forward(x, gamma_nz, matmul_dtype=jnp.float32))
    ref_f32 = _cam_reference(x, gamma_nz, jnp.float32)
    assert jnp.allclose(out_f32, ref_f32, atol=1e-2, rtol=1e-2), "f32 path mismatch"

    # Default bf16-matmul path (full MXU rate): tight vs matching-precision
    # reference, loose sanity vs the pure-f32 reference.
    out_bf16 = jax.block_until_ready(cam_module_forward(x, gamma_nz))
    ref_bf16 = _cam_reference(x, gamma_nz, jnp.bfloat16)
    assert jnp.allclose(out_bf16, ref_bf16, atol=2e-2, rtol=2e-2), "bf16 path mismatch"
    assert jnp.allclose(out_bf16, ref_f32, atol=1e-1, rtol=1e-1), "bf16 vs f32 sanity"

    # gamma == 0 (the module's initial parameter): output must equal the input.
    out_zero = jax.block_until_ready(cam_module_forward(x, gamma_zero))
    assert jnp.allclose(out_zero, x, atol=1e-6), "gamma=0 residual mismatch"

    print("KERNEL_OK")
</pallas_src>

<mosaic_0001>
module attributes {stable_mosaic.version = 11 : i64} {
  func.func @_cam_kernel(%arg0: i32, %arg1: i32, %arg2: memref<1xf32, #tpu.memory_space<smem>>, %arg3: memref<1x4x256xf32, #tpu.memory_space<vmem>>, %arg4: memref<1x4x256xf32, #tpu.memory_space<vmem>>, %arg5: memref<1x4x256xf32, #tpu.memory_space<vmem>>) attributes {dimension_semantics = [#tpu.dimension_semantics<parallel>, #tpu.dimension_semantics<parallel>], iteration_bounds = array<i64: 2, 1>, scalar_prefetch = 0 : i64, scratch_operands = 0 : i64, tpu.core_type = #tpu.core_type<tc>, window_params = [{transform_indices = @transform_0, window_bounds = array<i64: 1>}, {transform_indices = @transform_1, window_bounds = array<i64: 1, 4, 256>}, {transform_indices = @transform_2, window_bounds = array<i64: 1, 4, 256>}, {transform_indices = @transform_3, window_bounds = array<i64: 1, 4, 256>}]} {
    %c0 = arith.constant 0 : index
    %c0_0 = arith.constant 0 : index
    %c0_1 = arith.constant 0 : index
    %0 = vector.load %arg3[%c0, %c0_0, %c0_1] : memref<1x4x256xf32, #tpu.memory_space<vmem>>, vector<1x4x256xf32>
    %1 = vector.shape_cast %0 : vector<1x4x256xf32> to vector<4x256xf32>
    %c0_2 = arith.constant 0 : index
    %c0_3 = arith.constant 0 : index
    %c0_4 = arith.constant 0 : index
    %2 = vector.load %arg4[%c0_2, %c0_3, %c0_4] : memref<1x4x256xf32, #tpu.memory_space<vmem>>, vector<1x4x256xf32>
    %3 = vector.shape_cast %2 : vector<1x4x256xf32> to vector<4x256xf32>
    %cst = arith.constant dense<0.000000e+00> : vector<4x4xf32>
    %4 = tpu.matmul %3, %1, %cst {dimension_numbers = #tpu.dot_dimension_numbers<[1], [1], [0], [0], [0, 0, 1, 0], [], []>} : vector<4x256xf32>, vector<4x256xf32>, vector<4x4xf32> -> vector<4x4xf32>
    %cst_5 = arith.constant dense<0x7F800000> : vector<4xf32>
    %5 = vector.multi_reduction <minimumf>, %4, %cst_5 [1] : vector<4x4xf32> to vector<4xf32>
    %6 = vector.shape_cast %5 : vector<4xf32> to vector<4x1xf32>
    %7 = vector.broadcast %6 : vector<4x1xf32> to vector<4x4xf32>
    %8 = arith.subf %7, %4 : vector<4x4xf32>
    %9 = math.exp %8 : vector<4x4xf32>
    %cst_6 = arith.constant dense<0.000000e+00> : vector<4xf32>
    %10 = vector.multi_reduction <add>, %9, %cst_6 [1] : vector<4x4xf32> to vector<4xf32>
    %11 = vector.shape_cast %10 : vector<4xf32> to vector<4x1xf32>
    %12 = tpu.reciprocal %11 {approx = true} : vector<4x1xf32> -> vector<4x1xf32>
    %13 = vector.broadcast %12 : vector<4x1xf32> to vector<4x4xf32>
    %14 = arith.mulf %9, %13 : vector<4x4xf32>
    %cst_7 = arith.constant dense<0.000000e+00> : vector<4x256xf32>
    %15 = tpu.matmul %14, %1, %cst_7 {dimension_numbers = #tpu.dot_dimension_numbers<[1], [0], [0], [1], [0, 0, 1, 1], [], []>} : vector<4x4xf32>, vector<4x256xf32>, vector<4x256xf32> -> vector<4x256xf32>
    %c0_8 = arith.constant 0 : index
    %16 = memref.load %arg2[%c0_8] : memref<1xf32, #tpu.memory_space<smem>>
    %17 = vector.broadcast %16 : f32 to vector<4x256xf32>
    %18 = arith.mulf %17, %15 : vector<4x256xf32>
    %19 = arith.addf %18, %3 : vector<4x256xf32>
    %c0_9 = arith.constant 0 : index
    %c0_10 = arith.constant 0 : index
    %c0_11 = arith.constant 0 : index
    %20 = vector.load %arg5[%c0_9, %c0_10, %c0_11] : memref<1x4x256xf32, #tpu.memory_space<vmem>>, vector<1x4x256xf32>
    %21 = vector.shape_cast %20 : vector<1x4x256xf32> to vector<4x256xf32>
    %22 = vector.shape_cast %19 : vector<4x256xf32> to vector<1x4x256xf32>
    tpu.vector_store %arg5[%c0_9, %c0_10, %c0_11], %22 {strides = array<i32>} : memref<1x4x256xf32, #tpu.memory_space<vmem>>, vector<1x4x256xf32>,
    return
  }
  func.func @transform_0(%arg0: i32, %arg1: i32) -> i32 {
    %c0_i32 = arith.constant 0 : i32
    %c0_i32_0 = arith.constant 0 : i32
    return %c0_i32 : i32
  }
  func.func @transform_1(%arg0: i32, %arg1: i32) -> (i32, i32, i32) {
    %c0_i32 = arith.constant 0 : i32
    %c0_i32_0 = arith.constant 0 : i32
    %c0_i32_1 = arith.constant 0 : i32
    return %arg0, %c0_i32, %c0_i32_0 : i32, i32, i32
  }
  func.func @transform_2(%arg0: i32, %arg1: i32) -> (i32, i32, i32) {
    %c0_i32 = arith.constant 0 : i32
    %c0_i32_0 = arith.constant 0 : i32
    return %arg0, %arg1, %c0_i32 : i32, i32, i32
  }
  func.func @transform_3(%arg0: i32, %arg1: i32) -> (i32, i32, i32) {
    %c0_i32 = arith.constant 0 : i32
    %c0_i32_0 = arith.constant 0 : i32
    return %arg0, %arg1, %c0_i32 : i32, i32, i32
  }
}

</mosaic_0001>

<bundles_post_ra>
// kernel: tpu_custom_call.1
= control target key start
LH: loop header
LB: loop body
LE: loop exit
PB: predicated region body
PF: predicated region fallthrough
CT: control target
= control target key end

     0   :  { %s1048_s0 = inlined_call_operand.<no memory space> [shape: f32[1], index: 0, kind: input, shape index: {}]   ;;  %s1049_s1 = inlined_call_operand.hbm [shape: f32[2,4,256], index: 1, kind: input, shape index: {}]   ;;  %s1050_s2 = inlined_call_operand.hbm [shape: f32[2,4,256], index: 2, kind: input, shape index: {}]   ;;  %s1051_s3 = inlined_call_operand.hbm [shape: f32[2,4,256], index: 3, kind: output, shape index: {}]  }
   0x1   :  { %8 = sst [smem:[#allocation2]] %s1048_s0 }
   0x2   :  { %9 = vsyncpa [#allocation4], 0 }
   0x3   :  { %11 = vsyncpa [#allocation4 + $0x1], 0 }
   0x4   :  { %12 = vsyncpa [#allocation7], 0 }
   0x5   :  { %14 = vsyncpa [#allocation7 + $0x1], 0 }
   0x6   :  { %15 = vsyncpa [#allocation5], 0 }
   0x7   :  { %17 = vsyncpa [#allocation5 + $0x1], 0  ;;  %s823_s14 = smov 0   ;;  %s825_s15 = smov 0  }
   0x8   :  { %s827_s16 = smov 0   ;;  %s829_s17 = smov 0  }
   0x9   :  { %s831_s18 = smov 0   ;;  %s833_s19 = smov 0  }
   0xa LB: > { %s549_s0 = sadd.s32 4294967295, %s794_s19   ;;  %s550_s20 = sadd.s32 4294967294, %s794_s19   ;;  %s794_s19 = sphi %s833_s19, %s23_s19   ;;  %s790_s18 = sphi %s831_s18, %s1071_s18   ;;  %s786_s17 = sphi %s829_s17, %s1070_s17   ;;  %s782_s16 = sphi %s827_s16, %s1069_s16   ;;  %s778_s15 = sphi %s825_s15, %s1068_s15   ;;  %s774_s14 = sphi %s823_s14, %s1067_s14  }
   0xb   : > { %s35_s21 = sadd.s32 1, %s790_s18  ;;  %s63_s22 = sadd.s32 1, %s782_s16 }
   0xc   : > { %p37_p0 = scmp.ge.s32.totalorder %s35_s21, 2  ;;  %p70_p1 = scmp.ne.s32.totalorder %s782_s16, %s778_s15 }
   0xd   : > { %p71_p2 = scmp.eq.s32.totalorder %s794_s19, 0  ;;  %p76_p3 = scmp.ne.s32.totalorder %s778_s15, %s774_s14 }
   0xe   : > { %s1073_s21 = smov (%p37_p0, %s35_s21), 0  ;;  %p77_p5 = scmp.eq.s32.totalorder %s549_s0, 0 }
   0xf   : > { %p864_p4 = por %p71_p2, %p70_p1  ;;  %s60_s24 = ssub.s32 %s790_s18, %s1073_s21 }
  0x10   : > { %p130_p6 = scmp.eq.s32.totalorder %s549_s0, 1  ;;  %p61_p7 = scmp.eq.s32.totalorder %s60_s24, 0 }
  0x11   : > { %p870_p8 = por %p77_p5, %p76_p3  ;;  %p136_p10 = scmp.eq.s32.totalorder %s550_s20, 1 }
  0x12   : > { %p874_p9 = por %p130_p6, %p70_p1  ;;  %p591_p13 = scmp.lt.s32.totalorder %s794_s19, 2 }
  0x13   : > { %s1055_s25 = scalar_select %p870_p8, 1, 0 }
  0x14   : > { %s1056_s26 = scalar_select %p874_p9, 1, 0 }
  0x15   : > { %s879_s27 = scalar_select %p61_p7, %s782_s16, %s63_s22  }
  0x16   : > { %p881_p11 = por %p136_p10, %p76_p3  ;;  %s888_s29 = sand.u32 1, %s782_s16  }
  0x17   : > { %s553_s30 = sshll.u32 %s888_s29, 3  ;;  %s571_s4 = sshll.u32 %s790_s18, 7 }
  0x18   : > { %s1057_s28 = scalar_select %p881_p11, 1, 0 }
  0x19   : > { %s897_s7 = scalar_lea.hbm %s1049_s1, %s571_s4  ;;  %s163_s8 = scalar_lea.vmem [#allocation3], %s553_s30 }
  0x1a   : > { %s171_s9 = sshll.u32 %s163_s8, 4  ;;  %p905_p0 = pnand %p591_p13, %p864_p4  ;;  %s901_s9 = int_to_ptr.vmem [resolvable:$true] %s171_s9 }
  0x1b   : > { %s160_s11 = scalar_lea.sflag [#allocation4], %s888_s29  ;;  %s648_s12 = scalar_lea.hbm %s897_s7, 128 }
  0x1c   : > { %p649_p3 = scmp.ne.s32.totalorder %s897_s7, %s648_s12  ;;  %p650_p5 = pneg %p905_p0 }
  0x1d   : > { %s653_s20 = scalar_lea.hbm %s1049_s1, 256  ;;  %p654_p4 = scmp.lt.u32.totalorder %s897_s7, %s1049_s1 }
  0x1e   : > { %p651_p6 = pnand %p650_p5, %p649_p3  ;;  %p655_p10 = scmp.lt.u32.totalorder %s653_s20, %s648_s12 }
  0x1f   : > { %p657_p12 = scmp.lt.u32.totalorder %s648_s12, %s897_s7 }
  0x20   : > { %p652_p7 = pneg %p651_p6  ;;  %p656_p13 = por %p655_p10, %p654_p4 }
  0x22   : > { %p658_p1 = por %p657_p12, %p656_p13 }
  0x24   : > { %p659_p2 = pnand %p658_p1, %p652_p7 }
  0x26   : > { %662 = shalt.err (!%p659_p2)
}
  0x27   : > { %s663_s24 = scalar_lea.vmem %s901_s9, 128  ;;  %s796_s5 = smov [#allocation3]  }
  0x28   : > { %p664_p3 = scmp.ne.s32.totalorder %s901_s9, %s663_s24  ;;  %s668_s6 = sshll.u32 %s796_s5, 4  ;;  %s669_s6 = int_to_ptr.vmem [resolvable:$false] %s668_s6 }
  0x29   : > { %s670_s8 = scalar_lea.vmem %s669_s6, 256  ;;  %p671_p9 = scmp.lt.s32.totalorder %s901_s9, %s669_s6 }
  0x2a   : > { %p666_p6 = pnand %p664_p3, %p650_p5  ;;  %p672_p4 = scmp.lt.s32.totalorder %s670_s8, %s663_s24 }
  0x2c   : > { %p667_p11 = pneg %p666_p6  ;;  %p673_p10 = por %p672_p4, %p671_p9 }
  0x2e   : > { %p674_p12 = pnand %p673_p10, %p667_p11 }
  0x30   : > { %677 = shalt.err (!%p674_p12)
}
  0x31   : > { %583 = dma.hbm_to_vmem [thread:$0]  (!%p905_p0), %s897_s7, 128, %s901_s9, %s160_s11  }
  0x32   : > { %p1059_p1 = scmp.lt.s32.totalorder %s794_s19, 3  ;;  %p1060_p2 = scmp.ge.s32.totalorder %s794_s19, 1 }
  0x33   : > { %s950_s20 = scalar_lea.hbm %s1050_s2, %s571_s4  ;;  %s182_s22 = scalar_lea.vmem [#allocation6], %s553_s30 }
  0x34   : > { %p941_p7 = pnand %p1060_p2, %p1059_p1  ;;  %s192_s23 = sshll.u32 %s182_s22, 4  ;;  %s193_s23 = int_to_ptr.vmem [resolvable:$true] %s192_s23 }
  0x35   : > { %s179_s7 = scalar_lea.sflag [#allocation7], %s888_s29  ;;  %s678_s9 = scalar_lea.hbm %s950_s20, 128 }
  0x36   : > { %s1061_s12 = scalar_select %p941_p7, 1, 0 }
  0x37   : > { %p679_p9 = scmp.ne.s32.totalorder %s950_s20, %s678_s9  ;;  %s683_s4 = scalar_lea.hbm %s1050_s2, 256 }
  0x38   : > { %p684_p3 = scmp.lt.u32.totalorder %s950_s20, %s1050_s2  ;;  %p685_p6 = scmp.lt.u32.totalorder %s683_s4, %s678_s9 }
  0x39   : > { %p681_p11 = pnand %p679_p9, %p650_p5  ;;  %p687_p10 = scmp.lt.u32.totalorder %s678_s9, %s950_s20 }
  0x3a   : > { %p686_p4 = por %p685_p6, %p684_p3 }
  0x3b   : > { %p682_p13 = pneg %p681_p11 }
  0x3c   : > { %p688_p12 = por %p687_p10, %p686_p4 }
  0x3e   : > { %p689_p1 = pnand %p688_p12, %p682_p13 }
  0x40   : > { %692 = shalt.err (!%p689_p1)
}
  0x41   : > { %s693_s29 = scalar_lea.vmem %s193_s23, 128  ;;  %s797_s30 = smov [#allocation6]  }
  0x42   : > { %p694_p2 = scmp.ne.s32.totalorder %s193_s23, %s693_s29  ;;  %s698_s8 = sshll.u32 %s797_s30, 4  ;;  %s699_s8 = int_to_ptr.vmem [resolvable:$false] %s698_s8 }
  0x43   : > { %s700_s13 = scalar_lea.vmem %s699_s8, 256  ;;  %p701_p8 = scmp.lt.s32.totalorder %s193_s23, %s699_s8 }
  0x44   : > { %p696_p9 = pnand %p694_p2, %p650_p5  ;;  %p702_p7 = scmp.lt.s32.totalorder %s700_s13, %s693_s29 }
  0x46   : > { %p697_p11 = pneg %p696_p9  ;;  %p703_p3 = por %p702_p7, %p701_p8 }
  0x48   : > { %p704_p6 = pnand %p703_p3, %p697_p11 }
  0x4a   : > { %707 = shalt.err (!%p704_p6)
}
  0x4b   : > { %586 = dma.hbm_to_vmem [thread:$0]  (!%p905_p0), %s950_s20, 128, %s193_s23, %s179_s7  }
  0x4c   : > { %p1062_p13 = scmp.ne.s32.totalorder %s1061_s12, 0 }
  0x4d   : > { %s977_s0 = sand.u32 (!%p1062_p13), 1, %s778_s15   ;;  %p1063_p8 = scmp.ne.s32.totalorder (!%p1062_p13), %s1055_s25, 0 }
  0x4e   : > { %201 = sbr.rel (%p1062_p13) target bundleno = 854 (0x356), region = 32  ;;  %s980_s22 = sshll.u32 (!%p1062_p13), %s977_s0, 3 }
  0x4f   : > { %s204_s9 = scalar_lea.sflag (!%p1062_p13), [#allocation4], %s977_s0  ;;  %s207_s11 = scalar_lea.vmem (!%p1062_p13), [#allocation3], %s980_s22 }
  0x55   : > { %761 = dma.done.wait (%p1063_p8), %s204_s9, 128  }
  0x56   : > { %763 = vsyncadd (%p1063_p8), %s204_s9, 4294967168  ;;  %s213_s10 = scalar_lea.sflag [#allocation7], %s977_s0  ;;  %s216_s12 = scalar_lea.vmem [#allocation6], %s980_s22 }
  0x57   : > { %765 = dma.done.wait (%p1063_p8), %s213_s10, 128  }
  0x58   : > { %767 = vsyncadd (%p1063_p8), %s213_s10, 4294967168  ;;  %v244_v0 = vld [vmem:[%s207_s11] sm:$0xff]  ;;  %v245_v1 = vld [vmem:[%s216_s12] sm:$0xff]  ;;  %vm322_vm0 = vcmask 27648   ;;  %vm338_vm1 = vcmask 1043456   ;;  %v798_v12 = vmov 0.0  }
  0x59   : > { %v250_v2 = vcombine.high %v244_v0, %v244_v0  ;;  %v247_v3 = vcombine.high %v245_v1, %v245_v1  ;;  %407 = vmatprep.mubr.f32.mxu1 %v798_v12  ;;  %vm334_vm2 = vcmask 31744   ;;  %s414_s25 = sld [smem:[#allocation2]]  ;;  %s573_s20 = sshll.u32 %s786_s17, 7 }
  0x5a   : > { %s243_s23 = scalar_lea.vmem [#allocation8], %s980_s22  ;;  %s999_s5 = scalar_lea.hbm %s1051_s3, %s573_s20 }
  0x5b   : > { %252 = vmatprep.subr.mxu0 %v250_v2  ;;  %316 = vmatprep.mubr.f32.mxu0 %v247_v3  ;;  %s442_s7 = sshll.u32 %s243_s23, 4  ;;  %s426_s6 = scalar_lea.sflag [#allocation5], %s977_s0  ;;  %s1001_s7 = int_to_ptr.vmem [resolvable:$true] %s442_s7 }
  0x5c   : > { %253 = vmatpush1.xpose.msra.mxu0 %v244_v0  ;;  %563 = vmatprep.subr.msk.mxu1 %vm338_vm1, %v250_v2  ;;  %s708_s29 = scalar_lea.vmem %s1001_s7, 128  ;;  %p1064_p5 = scmp.ne.s32.totalorder %s1056_s26, 0 }
  0x5d   : > { %564 = vmatpush1.msk.msra.mxu1 %vm338_vm1, %v244_v0  ;;  %p709_p0 = scmp.ne.s32.totalorder %s1001_s7, %s708_s29  ;;  %s799_s17 = smov [#allocation8]  }
  0x5e   : > { %s712_s30 = sshll.u32 %s799_s17, 4  ;;  %s713_s30 = int_to_ptr.vmem [resolvable:$false] %s712_s30 }
  0x5f   : > { %317 = vmatmul.mubr.f32.vlgmr.msra.gmra.mrb[0].mxu0 %v245_v1  ;;  %v415_v16 = vstv %s414_s25  ;;  %p710_p7 = pnand %p709_p0, %p1064_p5  ;;  %s714_s8 = scalar_lea.vmem %s713_s30, 256 }
  0x60   : > { %p715_p10 = scmp.lt.s32.totalorder %s1001_s7, %s713_s30  ;;  %p716_p12 = scmp.lt.s32.totalorder %s714_s8, %s708_s29 }
  0x61   : > { %p711_p4 = pneg %p710_p7 }
  0x62   : > { %p717_p1 = por %p716_p12, %p715_p10 }
  0x64   : > { %p718_p2 = pnand %p717_p1, %p711_p4 }
 0x132   : > { %v318_v4 = vpop.f32.mrb[0].mxu0 }
 0x133   : > { %v320_v5 = vpop.f32.mrb[1].mxu0  ;;  %v323_v6 = vsel %vm322_vm0, %v318_v4, inf }
 0x134   : > { %324 = vmin.xlane.f32.xlu0 %v323_v6 }
 0x1c1   : > { %v325_v7 = vpop.xlane.xlu0 %324 }
 0x1c2   : > { %v326_v8 = vsub.f32 %v325_v7, %v318_v4 }
 0x1c4   : > { %v327_v9 = vmul.f32 1.442695, %v326_v8 }
 0x1c6   : > { %644 = vpow2.f32 %v327_v9 }
 0x1d0   : > { %v645_v10 = vpop.eup %644 }
 0x1d1   : > { %v329_v11 = vsel %vm322_vm0, %v645_v10, 0.0 }
 0x1d2   : > { %330 = vadd.xlane.f32.xlu0 %v329_v11 }
 0x25f   : > { %v331_v13 = vpop.xlane.xlu0 %330 }
 0x260   : > { %646 = vrcp.f32 %v331_v13 }
 0x26a   : > { %v647_v14 = vpop.eup %646 }
 0x26b   : > { %v333_v15 = vmul.f32 %v647_v14, %v645_v10 }
 0x26d   : > { %565 = vmatmul.mubr.msk.f32.vlgmr.msra.gmra.mrb[0].mxu1 %vm334_vm2, %v333_v15 }
 0x340   : > { %v409_v17 = vpop.f32.mrb[0].mxu1 }
 0x341   : > { %v416_v18 = vmul.f32 %v415_v16, %v409_v17  ;;  %v411_v19 = vpop.f32.mrb[1].mxu1 }
 0x342   : > { %v417_v20 = vmul.f32 %v415_v16, %v411_v19 }
 0x343   : > { %v418_v21 = vadd.f32 %v416_v18, %v245_v1 }
 0x344   : > { %v419_v22 = vadd.f32 %v417_v20, %v247_v3 }
 0x346   : > { %v422_v23 = vcombine.low %v418_v21, %v419_v22 }
 0x348   : > { %424 = vst [vmem:[%s243_s23] sm:$0xff] %v422_v23 }
 0x349   : > { %721 = shalt.err (!%p718_p2)
}
 0x34a   : > { %s722_s13 = scalar_lea.hbm %s999_s5, 128  ;;  %s726_s9 = scalar_lea.hbm %s1051_s3, 256 }
 0x34b   : > { %p723_p9 = scmp.ne.s32.totalorder %s999_s5, %s722_s13  ;;  %p727_p6 = scmp.lt.u32.totalorder %s999_s5, %s1051_s3 }
 0x34c   : > { %p728_p13 = scmp.lt.u32.totalorder %s726_s9, %s722_s13  ;;  %p730_p0 = scmp.lt.u32.totalorder %s722_s13, %s999_s5 }
 0x34d   : > { %p724_p11 = pnand %p723_p9, %p1064_p5 }
 0x34e   : > { %p729_p8 = por %p728_p13, %p727_p6 }
 0x34f   : > { %p725_p3 = pneg %p724_p11 }
 0x350   : > { %p731_p7 = por %p730_p0, %p729_p8 }
 0x352   : > { %p732_p4 = pnand %p731_p7, %p725_p3 }
 0x354   : > { %735 = shalt.err (!%p732_p4)
}
 0x355   : > { %578 = dma.vmem_to_hbm [thread:$0]  (%p1064_p5), %s1001_s7, 128, %s999_s5, %s426_s6  }
 0x356 PF: > { %s454_s12 = sand.u32 1, %s774_s14   ;;  %p1065_p10 = scmp.ne.s32.totalorder %s1057_s28, 0 }
 0x357   : > { %p1066_p12 = scmp.ge.s32.totalorder %s794_s19, 2  ;;  %s455_s25 = scalar_lea.sflag [#allocation5], %s454_s12 }
 0x359   : > { %p588_p1 = pnand %p1066_p12, %p1065_p10 }
 0x35b   : > { %769 = dma.done.wait (!%p588_p1), %s455_s25, 128  }
 0x35c   : > { %771 = vsyncadd (!%p588_p1), %s455_s25, 4294967168  ;;  %s23_s19 = sadd.s32 1, %s794_s19   ;;  %s1067_s14 = smov %s778_s15 }
 0x35d   : > { %p20_p2 = scmp.ge.s32.totalorder %s23_s19, 4   ;;  %s1068_s15 = smov %s782_s16 }
 0x35e   : > { %s1069_s16 = smov %s879_s27  ;;  %s1070_s17 = smov %s790_s18 }
 0x35f   : > { %s1071_s18 = smov %s1073_s21  ;;  %22 = sbr.rel (!%p20_p2) target bundleno = 10 (0xa), region = 90 }
 0x366   :  { %460 = vsyncpa [#allocation4], 1 }
 0x367   :  { %462 = vsyncpa [#allocation4 + $0x1], 1 }
 0x368   :  { %463 = vsyncpa [#allocation7], 1 }
 0x369   :  { %465 = vsyncpa [#allocation7 + $0x1], 1 }
 0x36a   :  { %466 = vsyncpa [#allocation5], 1 }
 0x36b   :  { %468 = vsyncpa [#allocation5 + $0x1], 1 }

</bundles_post_ra>
